<compile_context>
chip_gen: v6e
topology: v6e:2x2x1
jax: 0.10.0
libtpu: 0.0.40
codegen_flags: <defaults>
</compile_context>

<pallas_src>
import jax
import jax.numpy as jnp
from jax.experimental import pallas as pl
from jax.experimental.pallas import tpu as pltpu


def _round_up(v, m):
    return ((v + m - 1) // m) * m


def _sublane_granule(dtype):
    # Rows per sublane tile: 8 for 4-byte, 16 for 2-byte, 32 for 1-byte dtypes.
    return max(8, 32 // dtype.itemsize)


def _vmem_capacity_bytes():
    try:
        return int(pltpu.get_tpu_info().vmem_capacity_bytes)
    except Exception:
        return 64 * 1024 * 1024  # conservative (v7x per-core VMEM)


def _cost_estimate(E, B, IN, OUT, x, weight, bias, out_dtype):
    bytes_accessed = (x.size * x.dtype.itemsize
                      + weight.size * weight.dtype.itemsize
                      + bias.size * bias.dtype.itemsize
                      + E * B * OUT * out_dtype.itemsize)
    return pl.CostEstimate(flops=2 * E * B * IN * OUT,
                           transcendentals=0,
                           bytes_accessed=int(bytes_accessed))


# ---------------------------------------------------------------------------
# Path 1: tiny problems — single grid step, all heads resident.
# ---------------------------------------------------------------------------
def _small_direct_kernel(x_ref, w_ref, b_ref, o_ref):
    # x:(E,B,IN)  w:(E,IN,OUT)  b:(E,OUT)  o:(E,B,OUT)  (OUT % 128 == 0)
    for e in range(x_ref.shape[0]):  # static unroll; E is small on this path
        acc = jnp.dot(x_ref[e], w_ref[e], preferred_element_type=jnp.float32)
        o_ref[e] = (acc + b_ref[e][None, :].astype(jnp.float32)).astype(o_ref.dtype)


def _small_packed_kernel(x_ref, w_ref, b_ref, o_ref):
    # OUT < lane width: pack all heads into one lane-dense (B, E*OUT) store.
    heads = []
    for e in range(x_ref.shape[0]):
        acc = jnp.dot(x_ref[e], w_ref[e], preferred_element_type=jnp.float32)
        heads.append(acc + b_ref[e][None, :].astype(jnp.float32))
    o_ref[...] = jnp.concatenate(heads, axis=-1).astype(o_ref.dtype)


def _ensemble_fc_small(x, weight, bias):
    E, B, IN = x.shape
    OUT = weight.shape[-1]
    cost = _cost_estimate(E, B, IN, OUT, x, weight, bias, x.dtype)

    if OUT % 128 == 0:
        # Already lane-dense per head: write (E,B,OUT) directly, no concat /
        # post-kernel transpose (both are pure overhead here).
        return pl.pallas_call(
            _small_direct_kernel,
            out_shape=jax.ShapeDtypeStruct((E, B, OUT), x.dtype),
            cost_estimate=cost,
        )(x, weight, bias)

    out2d = pl.pallas_call(
        _small_packed_kernel,
        out_shape=jax.ShapeDtypeStruct((B, E * OUT), x.dtype),
        cost_estimate=cost,
    )(x, weight, bias)
    # (B, E*OUT) -> (E, B, OUT): wrapper-side layout plumbing only.
    return out2d.reshape(B, E, OUT).transpose(1, 0, 2)


# ---------------------------------------------------------------------------
# Path 2: general sizes — M/N/K tiling, f32 accumulation.
# ---------------------------------------------------------------------------
def _make_tiled_kernel(in_features, bk, acc_in_output):
    k_rem = in_features % bk  # static

    def kernel(x_ref, w_ref, b_ref, o_ref, *scratch):
        k = pl.program_id(3)
        last_k = pl.num_programs(3) - 1

        x = x_ref[...]
        w = w_ref[...]
        if k_rem != 0:
            # bk does not divide IN: the last K-block reads past the array
            # edge (undefined data).  Zero the invalid K-slice of BOTH
            # operands so the MXU contribution is exactly zero (NaN-safe),
            # instead of zero-padding x / weight in HBM.
            valid = in_features - k * bk
            col = jax.lax.broadcasted_iota(jnp.int32, x.shape, 1)
            x = jnp.where(col < valid, x, jnp.zeros_like(x))
            row = jax.lax.broadcasted_iota(jnp.int32, w.shape, 0)
            w = jnp.where(row < valid, w, jnp.zeros_like(w))

        partial = jnp.dot(x, w, preferred_element_type=jnp.float32)

        if acc_in_output:
            # f32 output: accumulate straight into the resident output block.
            @pl.when(k == 0)
            def _init():
                o_ref[...] = jnp.zeros_like(o_ref)

            o_ref[...] += partial

            @pl.when(k == last_k)
            def _finalize():
                o_ref[...] += b_ref[...].astype(o_ref.dtype)
        else:
            acc_ref = scratch[0]

            @pl.when(k == 0)
            def _init():
                acc_ref[...] = jnp.zeros_like(acc_ref)

            acc_ref[...] += partial

            @pl.when(k == last_k)
            def _finalize():
                o_ref[...] = (acc_ref[...] + b_ref[...].astype(jnp.float32)
                              ).astype(o_ref.dtype)

    return kernel


def _ensemble_fc_tiled(x, weight, bias, block_b, block_in, block_out):
    E, B, IN = x.shape
    OUT = weight.shape[-1]
    out_dtype = x.dtype
    sub = _sublane_granule(x.dtype)

    # Full-extent blocks whenever an axis fits a single block (legal even when
    # not (8,128)-aligned) -> no jnp.pad, no output slice, no extra HBM copies.
    # Only genuinely-tiled axes use hardware-aligned tile sizes.
    bm = B if B <= block_b else _round_up(block_b, sub)
    bk = IN if IN <= block_in else _round_up(block_in, 128)
    bn = OUT if OUT <= block_out else _round_up(block_out, 128)

    # v7x megacore: make sure the parallel part of the grid has >= 2 steps.
    if E * pl.cdiv(B, bm) * pl.cdiv(OUT, bn) < 2 and B >= 2 * sub:
        bm = _round_up(pl.cdiv(B, 2), sub)

    grid = (E, pl.cdiv(B, bm), pl.cdiv(OUT, bn), pl.cdiv(IN, bk))

    acc_in_output = (out_dtype == jnp.float32)
    scratch_shapes = [] if acc_in_output else [pltpu.VMEM((bm, bn), jnp.float32)]

    bias3 = bias.reshape(E, 1, OUT)  # metadata-only reshape

    # Scoped-VMEM budget from the actual double-buffered tile footprint.
    footprint = 2 * (bm * bk * x.dtype.itemsize
                     + bk * bn * weight.dtype.itemsize
                     + bn * bias.dtype.itemsize
                     + bm * bn * out_dtype.itemsize)
    if not acc_in_output:
        footprint += bm * bn * 4
    vmem_cap = _vmem_capacity_bytes()
    vmem_limit = int(min(max(vmem_cap - 8 * 2**20, 32 * 2**20),
                         max(32 * 2**20, 2 * footprint)))

    kernel = _make_tiled_kernel(IN, bk, acc_in_output)

    return pl.pallas_call(
        kernel,
        out_shape=jax.ShapeDtypeStruct((E, B, OUT), out_dtype),
        grid_spec=pltpu.PrefetchScalarGridSpec(
            num_scalar_prefetch=0,
            grid=grid,
            in_specs=[
                # Squeezed ensemble dim -> kernel sees clean 2-D tiles.
                pl.BlockSpec((pl.Squeezed(), bm, bk),
                             lambda e, i, j, k: (e, i, k)),
                pl.BlockSpec((pl.Squeezed(), bk, bn),
                             lambda e, i, j, k: (e, k, j)),
                pl.BlockSpec((pl.Squeezed(), 1, bn),
                             lambda e, i, j, k: (e, 0, j)),
            ],
            out_specs=pl.BlockSpec((pl.Squeezed(), bm, bn),
                                   lambda e, i, j, k: (e, i, j)),
            scratch_shapes=scratch_shapes,
        ),
        compiler_params=pltpu.CompilerParams(
            # E / B-tile / OUT-tile shard across TensorCores (v7x megacore);
            # K is the reduction axis and must stay sequential.
            dimension_semantics=("parallel", "parallel", "parallel",
                                 "arbitrary"),
            vmem_limit_bytes=vmem_limit,
        ),
        cost_estimate=_cost_estimate(E, B, IN, OUT, x, weight, bias, out_dtype),
    )(x, weight, bias3)


# ---------------------------------------------------------------------------
# Public entry point.
# ---------------------------------------------------------------------------
def ensemble_fc(x, weight, bias, *, block_b=512, block_in=1024, block_out=512,
                force_tiled=False):
    """EnsembleFC forward: (E,B,IN) x (E,IN,OUT) + (E,OUT) -> (E,B,OUT)."""
    E, B, IN = x.shape
    E_w, IN_w, OUT = weight.shape
    assert E == E_w and IN == IN_w and bias.shape == (E, OUT)
    # TODO(synk): bias=None (bias=False in the module) is not supported; the
    # PyTorch forward as written also requires a bias tensor.

    total_bytes = (x.size * x.dtype.itemsize
                   + weight.size * weight.dtype.itemsize
                   + bias.size * bias.dtype.itemsize
                   + E * B * OUT * x.dtype.itemsize)
    small_limit = min(16 * 2**20, _vmem_capacity_bytes() // 4)
    if (not force_tiled) and total_bytes <= small_limit and E <= 16:
        return _ensemble_fc_small(x, weight, bias)
    return _ensemble_fc_tiled(x, weight, bias, block_b, block_in, block_out)


if __name__ == "__main__":
    key = jax.random.PRNGKey(0)
    keys = jax.random.split(key, 12)

    # --- 1) Primary demo: small shapes consistent with the module ----------
    E, B, IN, OUT = 4, 8, 32, 32
    x = jax.random.normal(keys[0], (E, B, IN), dtype=jnp.float32)
    weight = jax.random.normal(keys[1], (E, IN, OUT), dtype=jnp.float32) * 0.1
    bias = jax.random.normal(keys[2], (E, OUT), dtype=jnp.float32) * 0.1

    out = jax.block_until_ready(ensemble_fc(x, weight, bias))
    ref = jnp.einsum("ebi,eio->ebo", x, weight) + bias[:, None, :]
    assert out.shape == (E, B, OUT)
    assert jnp.allclose(out, ref, atol=1e-5, rtol=1e-5)

    # --- 2) Small path, lane-dense OUT (direct (E,B,OUT) store) ------------
    E1, B1, IN1, OUT1 = 2, 16, 64, 128
    x1 = jax.random.normal(keys[3], (E1, B1, IN1), dtype=jnp.float32)
    w1 = jax.random.normal(keys[4], (E1, IN1, OUT1), dtype=jnp.float32) * 0.1
    b1 = jax.random.normal(keys[5], (E1, OUT1), dtype=jnp.float32) * 0.1
    out1 = jax.block_until_ready(ensemble_fc(x1, w1, b1))
    ref1 = (jnp.einsum("ebi,eio->ebo", x1, w1,
                       precision=jax.lax.Precision.HIGHEST)
            + b1[:, None, :])
    assert out1.shape == (E1, B1, OUT1)
    assert jnp.allclose(out1, ref1, atol=2e-3, rtol=2e-3)

    # --- 3) Tiled path: B/OUT edge blocks + in-kernel K-remainder mask ------
    E2, B2, IN2, OUT2 = 2, 13, 320, 200
    x2 = jax.random.normal(keys[6], (E2, B2, IN2), dtype=jnp.float32)
    w2 = jax.random.normal(keys[7], (E2, IN2, OUT2), dtype=jnp.float32) * 0.05
    b2 = jax.random.normal(keys[8], (E2, OUT2), dtype=jnp.float32) * 0.05
    out2 = jax.block_until_ready(
        ensemble_fc(x2, w2, b2, block_b=8, block_in=128, block_out=128,
                    force_tiled=True))
    ref2 = (jnp.einsum("ebi,eio->ebo", x2, w2,
                       precision=jax.lax.Precision.HIGHEST)
            + b2[:, None, :])
    assert out2.shape == (E2, B2, OUT2)
    assert jnp.allclose(out2, ref2, atol=2e-3, rtol=2e-3)

    # --- 4) Tiled path, bf16 (f32 scratch accumulator, full-extent K) -------
    E3, B3, IN3, OUT3 = 3, 24, 96, 160
    x3 = (jax.random.normal(keys[9], (E3, B3, IN3)) * 1.0).astype(jnp.bfloat16)
    w3 = (jax.random.normal(keys[10], (E3, IN3, OUT3)) * 0.05).astype(jnp.bfloat16)
    b3 = (jax.random.normal(keys[11], (E3, OUT3)) * 0.05).astype(jnp.bfloat16)
    out3 = jax.block_until_ready(
        ensemble_fc(x3, w3, b3, block_out=128, force_tiled=True))
    ref3 = (jnp.einsum("ebi,eio->ebo", x3.astype(jnp.float32),
                       w3.astype(jnp.float32),
                       precision=jax.lax.Precision.HIGHEST)
            + b3.astype(jnp.float32)[:, None, :])
    assert out3.shape == (E3, B3, OUT3) and out3.dtype == jnp.bfloat16
    assert jnp.allclose(out3.astype(jnp.float32), ref3, atol=5e-2, rtol=5e-2)

    print("KERNEL_OK")
</pallas_src>

<mosaic_0001>
module attributes {stable_mosaic.version = 11 : i64} {
  func.func @_small_packed_kernel(%arg0: memref<4x8x32xf32, #tpu.memory_space<vmem>>, %arg1: memref<4x32x32xf32, #tpu.memory_space<vmem>>, %arg2: memref<4x32xf32, #tpu.memory_space<vmem>>, %arg3: memref<8x128xf32, #tpu.memory_space<vmem>>) attributes {dimension_semantics = [], scalar_prefetch = 0 : i64, scratch_operands = 0 : i64, tpu.core_type = #tpu.core_type<tc>} {
    %c0 = arith.constant 0 : index
    %c0_0 = arith.constant 0 : index
    %c0_1 = arith.constant 0 : index
    %0 = vector.load %arg0[%c0, %c0_0, %c0_1] : memref<4x8x32xf32, #tpu.memory_space<vmem>>, vector<1x8x32xf32>
    %1 = vector.shape_cast %0 : vector<1x8x32xf32> to vector<8x32xf32>
    %c0_2 = arith.constant 0 : index
    %c0_3 = arith.constant 0 : index
    %c0_4 = arith.constant 0 : index
    %2 = vector.load %arg1[%c0_2, %c0_3, %c0_4] : memref<4x32x32xf32, #tpu.memory_space<vmem>>, vector<1x32x32xf32>
    %3 = vector.shape_cast %2 : vector<1x32x32xf32> to vector<32x32xf32>
    %cst = arith.constant dense<0.000000e+00> : vector<8x32xf32>
    %4 = tpu.matmul %1, %3, %cst {dimension_numbers = #tpu.dot_dimension_numbers<[1], [0], [0], [1], [0, 0, 1, 1], [], []>} : vector<8x32xf32>, vector<32x32xf32>, vector<8x32xf32> -> vector<8x32xf32>
    %c0_5 = arith.constant 0 : index
    %c0_6 = arith.constant 0 : index
    %5 = vector.load %arg2[%c0_5, %c0_6] : memref<4x32xf32, #tpu.memory_space<vmem>>, vector<1x32xf32>
    %6 = vector.shape_cast %5 : vector<1x32xf32> to vector<32xf32>
    %7 = vector.shape_cast %6 : vector<32xf32> to vector<1x32xf32>
    %8 = vector.broadcast %7 : vector<1x32xf32> to vector<8x32xf32>
    %9 = arith.addf %4, %8 : vector<8x32xf32>
    %c1 = arith.constant 1 : index
    %c0_7 = arith.constant 0 : index
    %c0_8 = arith.constant 0 : index
    %10 = vector.load %arg0[%c1, %c0_7, %c0_8] : memref<4x8x32xf32, #tpu.memory_space<vmem>>, vector<1x8x32xf32>
    %11 = vector.shape_cast %10 : vector<1x8x32xf32> to vector<8x32xf32>
    %c1_9 = arith.constant 1 : index
    %c0_10 = arith.constant 0 : index
    %c0_11 = arith.constant 0 : index
    %12 = vector.load %arg1[%c1_9, %c0_10, %c0_11] : memref<4x32x32xf32, #tpu.memory_space<vmem>>, vector<1x32x32xf32>
    %13 = vector.shape_cast %12 : vector<1x32x32xf32> to vector<32x32xf32>
    %cst_12 = arith.constant dense<0.000000e+00> : vector<8x32xf32>
    %14 = tpu.matmul %11, %13, %cst_12 {dimension_numbers = #tpu.dot_dimension_numbers<[1], [0], [0], [1], [0, 0, 1, 1], [], []>} : vector<8x32xf32>, vector<32x32xf32>, vector<8x32xf32> -> vector<8x32xf32>
    %c1_13 = arith.constant 1 : index
    %c0_14 = arith.constant 0 : index
    %15 = vector.load %arg2[%c1_13, %c0_14] : memref<4x32xf32, #tpu.memory_space<vmem>>, vector<1x32xf32>
    %16 = vector.shape_cast %15 : vector<1x32xf32> to vector<32xf32>
    %17 = vector.shape_cast %16 : vector<32xf32> to vector<1x32xf32>
    %18 = vector.broadcast %17 : vector<1x32xf32> to vector<8x32xf32>
    %19 = arith.addf %14, %18 : vector<8x32xf32>
    %c2 = arith.constant 2 : index
    %c0_15 = arith.constant 0 : index
    %c0_16 = arith.constant 0 : index
    %20 = vector.load %arg0[%c2, %c0_15, %c0_16] : memref<4x8x32xf32, #tpu.memory_space<vmem>>, vector<1x8x32xf32>
    %21 = vector.shape_cast %20 : vector<1x8x32xf32> to vector<8x32xf32>
    %c2_17 = arith.constant 2 : index
    %c0_18 = arith.constant 0 : index
    %c0_19 = arith.constant 0 : index
    %22 = vector.load %arg1[%c2_17, %c0_18, %c0_19] : memref<4x32x32xf32, #tpu.memory_space<vmem>>, vector<1x32x32xf32>
    %23 = vector.shape_cast %22 : vector<1x32x32xf32> to vector<32x32xf32>
    %cst_20 = arith.constant dense<0.000000e+00> : vector<8x32xf32>
    %24 = tpu.matmul %21, %23, %cst_20 {dimension_numbers = #tpu.dot_dimension_numbers<[1], [0], [0], [1], [0, 0, 1, 1], [], []>} : vector<8x32xf32>, vector<32x32xf32>, vector<8x32xf32> -> vector<8x32xf32>
    %c2_21 = arith.constant 2 : index
    %c0_22 = arith.constant 0 : index
    %25 = vector.load %arg2[%c2_21, %c0_22] : memref<4x32xf32, #tpu.memory_space<vmem>>, vector<1x32xf32>
    %26 = vector.shape_cast %25 : vector<1x32xf32> to vector<32xf32>
    %27 = vector.shape_cast %26 : vector<32xf32> to vector<1x32xf32>
    %28 = vector.broadcast %27 : vector<1x32xf32> to vector<8x32xf32>
    %29 = arith.addf %24, %28 : vector<8x32xf32>
    %c3 = arith.constant 3 : index
    %c0_23 = arith.constant 0 : index
    %c0_24 = arith.constant 0 : index
    %30 = vector.load %arg0[%c3, %c0_23, %c0_24] : memref<4x8x32xf32, #tpu.memory_space<vmem>>, vector<1x8x32xf32>
    %31 = vector.shape_cast %30 : vector<1x8x32xf32> to vector<8x32xf32>
    %c3_25 = arith.constant 3 : index
    %c0_26 = arith.constant 0 : index
    %c0_27 = arith.constant 0 : index
    %32 = vector.load %arg1[%c3_25, %c0_26, %c0_27] : memref<4x32x32xf32, #tpu.memory_space<vmem>>, vector<1x32x32xf32>
    %33 = vector.shape_cast %32 : vector<1x32x32xf32> to vector<32x32xf32>
    %cst_28 = arith.constant dense<0.000000e+00> : vector<8x32xf32>
    %34 = tpu.matmul %31, %33, %cst_28 {dimension_numbers = #tpu.dot_dimension_numbers<[1], [0], [0], [1], [0, 0, 1, 1], [], []>} : vector<8x32xf32>, vector<32x32xf32>, vector<8x32xf32> -> vector<8x32xf32>
    %c3_29 = arith.constant 3 : index
    %c0_30 = arith.constant 0 : index
    %35 = vector.load %arg2[%c3_29, %c0_30] : memref<4x32xf32, #tpu.memory_space<vmem>>, vector<1x32xf32>
    %36 = vector.shape_cast %35 : vector<1x32xf32> to vector<32xf32>
    %37 = vector.shape_cast %36 : vector<32xf32> to vector<1x32xf32>
    %38 = vector.broadcast %37 : vector<1x32xf32> to vector<8x32xf32>
    %39 = arith.addf %34, %38 : vector<8x32xf32>
    %40 = tpu.concatenate %9, %19, %29, %39 in 1 : vector<8x32xf32>, vector<8x32xf32>, vector<8x32xf32>, vector<8x32xf32> -> vector<8x128xf32>
    %c0_31 = arith.constant 0 : index
    %c0_32 = arith.constant 0 : index
    %41 = vector.load %arg3[%c0_31, %c0_32] : memref<8x128xf32, #tpu.memory_space<vmem>>, vector<8x128xf32>
    tpu.vector_store %arg3[%c0_31, %c0_32], %40 {strides = array<i32>} : memref<8x128xf32, #tpu.memory_space<vmem>>, vector<8x128xf32>,
    return
  }
}

</mosaic_0001>

<bundles_post_ra>
// kernel: tpu_custom_call.1
= control target key start
LH: loop header
LB: loop body
LE: loop exit
PB: predicated region body
PF: predicated region fallthrough
CT: control target
= control target key end

     0   :  { %8 = vsyncpa [#allocation3], 0  ;;  %s648_s0 = inlined_call_operand.hbm [shape: f32[4,8,32], index: 0, kind: input, shape index: {}]   ;;  %s649_s1 = inlined_call_operand.hbm [shape: f32[4,32,32], index: 1, kind: input, shape index: {}]   ;;  %s650_s2 = inlined_call_operand.hbm [shape: f32[4,32], index: 2, kind: input, shape index: {}]   ;;  %s651_s3 = inlined_call_operand.hbm [shape: f32[8,128], index: 3, kind: output, shape index: {}]  }
   0x1   :  { %9 = vsyncpa [#allocation6], 0 }
   0x2   :  { %10 = vsyncpa [#allocation4], 0  ;;  %s596_s12 = smov [#allocation5]   ;;  %s597_s14 = smov [#allocation2]  }
   0x3   :  { %s28_s13 = sshll.u32 %s596_s12, 4  ;;  %s16_s15 = sshll.u32 %s597_s14, 4  ;;  %s29_s13 = int_to_ptr.vmem [resolvable:$true] %s28_s13  ;;  %s17_s15 = int_to_ptr.vmem [resolvable:$true] %s16_s15 }
   0x4   :  { %s518_s16 = scalar_lea.vmem %s29_s13, 2048  ;;  %p523_p1 = scmp.lt.s32.totalorder %s29_s13, %s29_s13 }
   0x5   :  { %p519_p0 = scmp.ne.s32.totalorder %s29_s13, %s518_s16  ;;  %p524_p2 = scmp.lt.s32.totalorder %s518_s16, %s518_s16 }
   0x7   :  { %p525_p3 = por %p524_p2, %p523_p1 }
   0x9   :  { %p526_p4 = pnand %p525_p3, %p519_p0 }
   0xb   :  { %529 = shalt.err (!%p526_p4)
}
   0xc   :  { %s598_s17 = smov 128   ;;  %s599_s18 = smov 8  }
   0xd   :  { %34 = dma.hbm_to_vmem [thread:$0]  %s649_s1, 2048, %s29_s13, [#allocation6], %s598_s17, %s598_s17, %s599_s18  }
   0xe   :  { %s538_s21 = scalar_lea.vmem %s17_s15, 512  ;;  %p543_p6 = scmp.lt.s32.totalorder %s17_s15, %s17_s15 }
   0xf   :  { %p539_p5 = scmp.ne.s32.totalorder %s17_s15, %s538_s21  ;;  %p544_p7 = scmp.lt.s32.totalorder %s538_s21, %s538_s21 }
  0x11   :  { %p545_p8 = por %p544_p7, %p543_p6 }
  0x13   :  { %p546_p9 = pnand %p545_p8, %p539_p5 }
  0x15   :  { %549 = shalt.err (!%p546_p9)
}
  0x16   :  { %22 = dma.hbm_to_vmem [thread:$0]  %s648_s0, 512, %s17_s15, [#allocation3], %s598_s17, %s598_s17, %s599_s18  }
  0x17   :  { %s600_s24 = smov [#allocation7]  }
  0x18   :  { %s41_s25 = sshll.u32 %s600_s24, 4  ;;  %s42_s25 = int_to_ptr.vmem [resolvable:$true] %s41_s25 }
  0x19   :  { %s558_s26 = scalar_lea.vmem %s42_s25, 64  ;;  %p563_p11 = scmp.lt.s32.totalorder %s42_s25, %s42_s25 }
  0x1a   :  { %p559_p10 = scmp.ne.s32.totalorder %s42_s25, %s558_s26  ;;  %p564_p12 = scmp.lt.s32.totalorder %s558_s26, %s558_s26 }
  0x1c   :  { %p565_p13 = por %p564_p12, %p563_p11 }
  0x1e   :  { %p566_p0 = pnand %p565_p13, %p559_p10 }
  0x20   :  { %569 = shalt.err (!%p566_p0)
}
  0x21   :  { %44 = dma.hbm_to_vmem [thread:$0]  %s650_s2, 64, %s42_s25, [#allocation6]  }
  0x22   :  { %590 = dma.done.wait [#allocation3], 512  }
  0x23   :  { %591 = vsyncadd [#allocation3], 4294966784 }
  0x24   :  { %592 = dma.done.wait [#allocation6], 2112  }
  0x25   :  { %593 = vsyncadd [#allocation6], 4294965184  ;;  %v601_v0 = vmov 0.0   ;;  %vm602_vm0 = vmmov 0   ;;  %v58_v1 = vld [vmem:[#allocation5 + $0x18] sm:$0xff]  ;;  %v57_v3 = vld [vmem:[#allocation5 + $0x10] sm:$0xff] }
  0x26   :  { %455 = vmatprep.subr.mxu0 %v601_v0  ;;  %466 = vmatprep.subr.mxu1 %v601_v0  ;;  %v144_v2 = vld [vmem:[#allocation5 + $0x38] sm:$0xff]  ;;  %v143_v4 = vld [vmem:[#allocation5 + $0x30] sm:$0xff]  ;;  %v56_v5 = vld [vmem:[#allocation5 + $0x8] sm:$0xff]  ;;  %vm64_vm1 = vcmask 261120   ;;  %s603_s0 = smov 32   ;;  %s604_s2 = smov 64  }
  0x27   :  { %463 = vmatprep.mubr.msk.f32.mxu0 %vm602_vm0, %v601_v0  ;;  %474 = vmatprep.mubr.msk.f32.mxu1 %vm602_vm0, %v601_v0  ;;  %v142_v6 = vld [vmem:[#allocation5 + $0x28] sm:$0xff]  ;;  %v55_v7 = vld [vmem:[#allocation5] sm:$0xff]  ;;  %v229_v11 = vld [vmem:[#allocation5 + $0x58] sm:$0xff]  ;;  %s605_s28 = smov 96   ;;  %vm406_vm2 = vcmask 523264   ;;  %s606_s29 = smov [#allocation8]  }
  0x28   :  { %456 = vmatpush3.msra.mxu0 %v58_v1  ;;  %467 = vmatpush3.msra.mxu1 %v144_v2  ;;  %v141_v8 = vld [vmem:[#allocation5 + $0x20] sm:$0xff]  ;;  %v139_v10 = vld [vmem:[#allocation2 + $0x8] sm:$0xff]  ;;  %v314_v12 = vld [vmem:[#allocation5 + $0x78] sm:$0xff]  ;;  %s417_s30 = sshll.u32 %s606_s29, 4  ;;  %vm408_vm3 = vcmask 785408   ;;  %s418_s30 = int_to_ptr.vmem [resolvable:$true] %s417_s30 }
  0x29   :  { %457 = vmatprep.subr.mxu0 %v601_v0  ;;  %468 = vmatprep.subr.mxu1 %v601_v0  ;;  %v54_v9 = vld [vmem:[#allocation2] sm:$0xff]  ;;  %v228_v13 = vld [vmem:[#allocation5 + $0x50] sm:$0xff]  ;;  %v227_v15 = vld [vmem:[#allocation5 + $0x48] sm:$0xff]  ;;  %s570_s4 = scalar_lea.vmem %s418_s30, 128  ;;  %p575_p2 = scmp.lt.s32.totalorder %s418_s30, %s418_s30 }
  0x2a   :  { %458 = vmatpush3.msra.mxu0 %v57_v3  ;;  %469 = vmatpush3.msra.mxu1 %v143_v4  ;;  %v313_v14 = vld [vmem:[#allocation5 + $0x70] sm:$0xff]  ;;  %v312_v16 = vld [vmem:[#allocation5 + $0x68] sm:$0xff]  ;;  %v226_v17 = vld [vmem:[#allocation5 + $0x40] sm:$0xff]  ;;  %p571_p1 = scmp.ne.s32.totalorder %s418_s30, %s570_s4  ;;  %p576_p3 = scmp.lt.s32.totalorder %s570_s4, %s570_s4 }
  0x2b   :  { %459 = vmatprep.subr.mxu0 %v601_v0  ;;  %470 = vmatprep.subr.mxu1 %v601_v0  ;;  %v311_v18 = vld [vmem:[#allocation5 + $0x60] sm:$0xff]  ;;  %v224_v19 = vld [vmem:[#allocation2 + $0x10] sm:$0xff]  ;;  %v309_v20 = vld [vmem:[#allocation2 + $0x18] sm:$0xff] }
  0x2c   :  { %460 = vmatpush3.msra.mxu0 %v56_v5  ;;  %471 = vmatpush3.msra.mxu1 %v142_v6  ;;  %v429_v21 = vld [vmem:[#allocation7 + $0x1] ss:$0 sm:$0xff]  ;;  %v431_v27 = vld [vmem:[#allocation7 + $0x2] ss:$0 sm:$0xff]  ;;  %v433_v28 = vld [vmem:[#allocation7 + $0x3] ss:$0 sm:$0xff]  ;;  %p577_p4 = por %p576_p3, %p575_p2 }
  0x2d   :  { %461 = vmatprep.subr.mxu0 %v601_v0  ;;  %472 = vmatprep.subr.mxu1 %v601_v0  ;;  %v427_v35 = vld [vmem:[#allocation7] ss:$0 sm:$0xff] }
  0x2e   :  { %462 = vmatpush3.msra.mxu0 %v55_v7  ;;  %473 = vmatpush3.msra.mxu1 %v141_v8  ;;  %p578_p5 = pnand %p577_p4, %p571_p1 }
  0x2f   :  { %464 = vmatmul.mubr.msk.f32.vlgmr.msra.gmra.mxu0 %vm64_vm1, %v54_v9  ;;  %475 = vmatmul.mubr.msk.f32.vlgmr.msra.gmra.mxu1 %vm64_vm1, %v139_v10 }
  0x30   :  { %477 = vmatprep.subr.mxu0 %v601_v0  ;;  %488 = vmatprep.subr.mxu1 %v601_v0 }
  0x31   :  { %478 = vmatpush3.msra.mxu0 %v229_v11  ;;  %489 = vmatpush3.msra.mxu1 %v314_v12 }
  0x32   :  { %479 = vmatprep.subr.mxu0 %v601_v0  ;;  %490 = vmatprep.subr.mxu1 %v601_v0 }
  0x33   :  { %480 = vmatpush3.msra.mxu0 %v228_v13  ;;  %491 = vmatpush3.msra.mxu1 %v313_v14 }
  0x34   :  { %481 = vmatprep.subr.mxu0 %v601_v0  ;;  %492 = vmatprep.subr.mxu1 %v601_v0 }
  0x35   :  { %482 = vmatpush3.msra.mxu0 %v227_v15  ;;  %493 = vmatpush3.msra.mxu1 %v312_v16 }
  0x36   :  { %483 = vmatprep.subr.mxu0 %v601_v0  ;;  %494 = vmatprep.subr.mxu1 %v601_v0 }
  0x37   :  { %484 = vmatpush3.msra.mxu0 %v226_v17  ;;  %485 = vmatprep.mubr.msk.f32.mxu0 %vm602_vm0, %v601_v0 }
  0x38   :  { %495 = vmatpush3.msra.mxu1 %v311_v18  ;;  %496 = vmatprep.mubr.msk.f32.mxu1 %vm602_vm0, %v601_v0 }
  0x39   :  { %486 = vmatmul.mubr.msk.f32.vlgmr.msra.gmra.mxu0 %vm64_vm1, %v224_v19  ;;  %497 = vmatmul.mubr.msk.f32.vlgmr.msra.gmra.mxu1 %vm64_vm1, %v309_v20 }
  0xef   :  { %v134_v22 = vpop.f32.mrf.mxu0  ;;  %v219_v23 = vpop.f32.mrf.mxu1 }
  0xf0   :  { %v220_v24 = vadd.f32 %v429_v21, %v219_v23  ;;  %v135_v37 = vadd.f32 %v427_v35, %v134_v22 }
  0xf1   :  { %v465_v25 = vpop.f32.mrf.mxu0  ;;  %v476_v26 = vpop.f32.mrf.mxu1 }
  0xf2   :  { %394 = vrot.lane.b32.xlu0 %v220_v24, %s603_s0 }
  0xf9   :  { %v304_v29 = vpop.f32.mrf.mxu0  ;;  %v389_v30 = vpop.f32.mrf.mxu1 }
  0xfa   :  { %v305_v31 = vadd.f32 %v431_v27, %v304_v29  ;;  %v390_v32 = vadd.f32 %v433_v28, %v389_v30 }
  0xfb   :  { %v487_v33 = vpop.f32.mrf.mxu0  ;;  %v498_v34 = vpop.f32.mrf.mxu1 }
  0xfc   :  { %398 = vrot.lane.b32.xlu0 %v305_v31, %s604_s2  ;;  %402 = vrot.lane.b32.xlu1 %v390_v32, %s605_s28 }
 0x164   :  { %v395_v36 = vpop.permute.xlu0 %394 }
 0x165   :  { %v405_v38 = vsel %vm64_vm1, %v135_v37, %v395_v36 }
 0x16e   :  { %v399_v39 = vpop.permute.xlu0 %398  ;;  %v403_v40 = vpop.permute.xlu1 %402 }
 0x16f   :  { %v407_v41 = vsel %vm406_vm2, %v405_v38, %v399_v39 }
 0x170   :  { %v409_v42 = vsel %vm408_vm3, %v407_v41, %v403_v40 }
 0x171   :  { %410 = vst [vmem:[#allocation8] sm:$0xff] %v409_v42 }
 0x172   :  { %581 = shalt.err (!%p578_p5)
}
 0x173   :  { %420 = dma.vmem_to_hbm [thread:$0]  %s418_s30, 128, %s651_s3, [#allocation4]  }
 0x174   :  { %594 = dma.done.wait [#allocation4], 128  }
 0x175   :  { %595 = vsyncadd [#allocation4], 4294967168 }
 0x176   :  { %424 = vsyncpa [#allocation3], 1 }
 0x177   :  { %425 = vsyncpa [#allocation6], 1 }
 0x178   :  { %426 = vsyncpa [#allocation4], 1 }

</bundles_post_ra>
